<compile_context>
chip_gen: v7x
topology: tpu7x:2x2x1
jax: 0.10.0
libtpu: 0.0.40
codegen_flags: <defaults>
</compile_context>

<pallas_src>
import functools

import jax
import jax.numpy as jnp
from jax.experimental import pallas as pl
from jax.experimental.pallas import tpu as pltpu


_VMEM = pl.BlockSpec(memory_space=pltpu.MemorySpace.VMEM)
_LANE = 128


def _pad128(n):
    return max(_LANE, ((n + _LANE - 1) // _LANE) * _LANE)


# ----------------------------------------------------------------------------
# Pallas kernels
# ----------------------------------------------------------------------------
def _conv_relu_pool_kernel(p_ref, w_ref, b_ref, o_ref, *, s_pad):
    """Fused conv (one im2col matmul over all 4 pool corners) + 2x2 max-pool
    + bias + ReLU.

    p_ref: (CKK, 4*s_pad) bf16 -- corner k = dy*2+dx of each 2x2 pool window
           lives in lane block [k*s_pad, (k+1)*s_pad); valid lanes = S.
    w_ref: (Cout, CKK) bf16.   b_ref: (Cout, 1) f32.   o_ref: (Cout, s_pad) f32.

    One bf16 MXU matmul with f32 accumulation; the pool max is a VPU max over
    four 128-aligned lane slices of the f32 result.  Bias-add and ReLU commute
    with the max (monotone, bias shared across the window), so they are
    applied once, after pooling, in f32.
    """
    y = jnp.dot(w_ref[...], p_ref[...], preferred_element_type=jnp.float32)
    m = jnp.maximum(
        jnp.maximum(y[:, 0 * s_pad:1 * s_pad], y[:, 1 * s_pad:2 * s_pad]),
        jnp.maximum(y[:, 2 * s_pad:3 * s_pad], y[:, 3 * s_pad:4 * s_pad]),
    )
    o_ref[...] = jnp.maximum(m + b_ref[...], 0.0).astype(o_ref.dtype)


def _fc_head_kernel(x_ref, w1_ref, b1_ref, w2_ref, b2_ref, w3_ref, b3_ref, o_ref):
    """Fused fc1+ReLU -> fc2+ReLU -> fc3.

    x_ref:  (B, 400) bf16 in PyTorch NCHW-flatten order (c*25 + h*5 + w), so
            fc1 is a single K=400 bf16 matmul with f32 accumulation.
    w1_ref: (400, 120) bf16, w2_ref: (120, 84) bf16,
    w3_ref: (84, 128) bf16 zero-padded on the output lanes for a lane-dense
            final store; biases are f32 (1, N).  o_ref: (B, 128) f32.
    Intermediates (B,120)/(B,84) never leave vregs/VMEM; epilogues stay f32.
    """
    h = jnp.dot(x_ref[...], w1_ref[...], preferred_element_type=jnp.float32)
    h = jnp.maximum(h + b1_ref[...], 0.0)
    h = jnp.dot(h.astype(w2_ref.dtype), w2_ref[...], preferred_element_type=jnp.float32)
    h = jnp.maximum(h + b2_ref[...], 0.0)
    o = jnp.dot(h.astype(w3_ref.dtype), w3_ref[...], preferred_element_type=jnp.float32)
    o_ref[...] = (o + b3_ref[...]).astype(o_ref.dtype)


# ----------------------------------------------------------------------------
# XLA glue (tiny at LeNet sizes) + wrappers
# ----------------------------------------------------------------------------
def _build_corner_matrix(x_cbhw, kh, kw, pad, s_pad):
    """x: (Cin, B, H, W) -> (CKK, 4*s_pad) bf16 corner-packed im2col matrix.

    Rows are ordered (c, i, j) to match weight.reshape(Cout, -1).  Lane block
    k = dy*2+dx holds the conv positions (2*po+dy, 2*qo+dx) flattened as
    b*Hp*Wp + po*Wp + qo.  Built with kh*kw shifted slices + one stack + one
    reshape + ONE transpose (no per-corner strided gathers).
    """
    # TODO(synk): move this extraction in-kernel (pass the padded raw
    # (Cin,B,H,W) slab, a few KB) to cut HBM traffic further; kept as XLA glue
    # here to avoid non-(8,128)-aligned in-kernel reshapes.
    Cin, B, H, W = x_cbhw.shape
    x = x_cbhw.astype(jnp.bfloat16)
    if pad:
        x = jnp.pad(x, ((0, 0), (0, 0), (pad, pad), (pad, pad)))
    Ho = H + 2 * pad - kh + 1
    Wo = W + 2 * pad - kw + 1
    Hp, Wp = Ho // 2, Wo // 2
    S = B * Hp * Wp

    shifts = [x[:, :, i:i + Ho, j:j + Wo] for i in range(kh) for j in range(kw)]
    patches = jnp.stack(shifts, axis=1)                    # (Cin, KK, B, Ho, Wo)
    ckk = Cin * kh * kw
    patches = patches.reshape(ckk, B, Hp, 2, Wp, 2)        # split out the 2x2 corners
    corners = jnp.transpose(patches, (0, 3, 5, 1, 2, 4))   # (CKK, 2, 2, B, Hp, Wp)
    corners = corners.reshape(ckk, 4, S)
    corners = jnp.pad(corners, ((0, 0), (0, 0), (0, s_pad - S)))
    return corners.reshape(ckk, 4 * s_pad), Hp, Wp


def conv_relu_pool_pallas(x_cbhw, w_mat, b_col, *, kh, kw, pad):
    """x: (Cin, B, H, W) f32, w_mat: (Cout, Cin*kh*kw) bf16, b_col: (Cout, 1) f32
    -> (Cout, B, Hp, Wp) f32 (fused conv + bias + ReLU + 2x2 max-pool)."""
    # TODO(synk): for large batch, grid-tile the S lane axis with
    # dimension_semantics=("parallel",) so v7x's 2 TensorCores are used and
    # VMEM stays bounded (budget against 64 MiB on v7x); at B=2 a single
    # block is optimal.
    Cin, B, H, W = x_cbhw.shape
    Cout, ckk = w_mat.shape
    assert ckk == Cin * kh * kw
    Hp = (H + 2 * pad - kh + 1) // 2
    Wp = (W + 2 * pad - kw + 1) // 2
    S = B * Hp * Wp
    s_pad = _pad128(S)
    corners, Hp, Wp = _build_corner_matrix(x_cbhw, kh, kw, pad, s_pad)
    out = pl.pallas_call(
        functools.partial(_conv_relu_pool_kernel, s_pad=s_pad),
        out_shape=jax.ShapeDtypeStruct((Cout, s_pad), jnp.float32),
        in_specs=[_VMEM] * 3,
        out_specs=_VMEM,
    )(corners, w_mat, b_col)
    return out[:, :S].reshape(Cout, B, Hp, Wp)


def fc_head_pallas(x_flat_bf16, pk):
    """x: (B, 400) bf16 -> logits (B, 10) f32; single fused pallas_call."""
    B = x_flat_bf16.shape[0]
    out = pl.pallas_call(
        _fc_head_kernel,
        out_shape=jax.ShapeDtypeStruct((B, _LANE), jnp.float32),
        in_specs=[_VMEM] * 7,
        out_specs=_VMEM,
    )(x_flat_bf16, pk["wf1t"], pk["bf1r"], pk["wf2t"], pk["bf2r"],
      pk["wf3p"], pk["bf3p"])
    return out[:, :10]


# ----------------------------------------------------------------------------
# Parameters
# ----------------------------------------------------------------------------
def init_lenet_params(key):
    """PyTorch-shaped LeNet parameters (same shapes as the nn.Module)."""
    ks = jax.random.split(key, 10)
    s = 0.1
    return {
        "w1": jax.random.normal(ks[0], (6, 1, 5, 5), jnp.float32) * s,
        "b1": jax.random.normal(ks[1], (6,), jnp.float32) * s,
        "w2": jax.random.normal(ks[2], (16, 6, 5, 5), jnp.float32) * s,
        "b2": jax.random.normal(ks[3], (16,), jnp.float32) * s,
        "wf1": jax.random.normal(ks[4], (120, 400), jnp.float32) * s,
        "bf1": jax.random.normal(ks[5], (120,), jnp.float32) * s,
        "wf2": jax.random.normal(ks[6], (84, 120), jnp.float32) * s,
        "bf2": jax.random.normal(ks[7], (84,), jnp.float32) * s,
        "wf3": jax.random.normal(ks[8], (10, 84), jnp.float32) * s,
        "bf3": jax.random.normal(ks[9], (10,), jnp.float32) * s,
    }


def pack_lenet_params(p):
    """One-time conversion to kernel layouts: bf16 MXU operands, f32 biases,
    fc3 zero-padded to 128 output lanes.  No .T/reshape inside the forward."""
    w3t = p["wf3"].T                                                  # (84, 10)
    w3p = jnp.zeros((84, _LANE), jnp.float32).at[:, :10].set(w3t)
    b3p = jnp.zeros((1, _LANE), jnp.float32).at[0, :10].set(p["bf3"])
    return {
        "w1m": p["w1"].reshape(6, 1 * 5 * 5).astype(jnp.bfloat16),    # (Cout, CKK)
        "b1c": p["b1"].reshape(6, 1),                                 # f32
        "w2m": p["w2"].reshape(16, 6 * 5 * 5).astype(jnp.bfloat16),
        "b2c": p["b2"].reshape(16, 1),
        "wf1t": p["wf1"].T.astype(jnp.bfloat16),                      # (400, 120)
        "bf1r": p["bf1"].reshape(1, 120),
        "wf2t": p["wf2"].T.astype(jnp.bfloat16),                      # (120, 84)
        "bf2r": p["bf2"].reshape(1, 84),
        "wf3p": w3p.astype(jnp.bfloat16),                             # (84, 128)
        "bf3p": b3p,                                                  # (1, 128) f32
    }


# ----------------------------------------------------------------------------
# LeNet forward
# ----------------------------------------------------------------------------
@jax.jit
def lenet_forward(x_nchw, pk):
    # x: (B, 1, 28, 28) NCHW float32 (PyTorch convention).
    B = x_nchw.shape[0]
    x = jnp.transpose(x_nchw, (1, 0, 2, 3))                                  # (1, B, 28, 28)
    x = conv_relu_pool_pallas(x, pk["w1m"], pk["b1c"], kh=5, kw=5, pad=2)    # (6, B, 14, 14)
    x = conv_relu_pool_pallas(x, pk["w2m"], pk["b2c"], kh=5, kw=5, pad=0)    # (16, B, 5, 5)
    # PyTorch NCHW flatten (index = c*25 + h*5 + w) so fc1 is ONE K=400 matmul.
    # TODO(synk): fold this tiny re-layout into a fused conv2+fc pallas_call
    # once an aligned in-kernel (16,B,25)->(B,400) transform is available.
    x = jnp.transpose(x.reshape(16, B, 25), (1, 0, 2)).reshape(B, 16 * 25)
    return fc_head_pallas(x.astype(jnp.bfloat16), pk)                        # (B, 10)


if __name__ == "__main__":
    key = jax.random.PRNGKey(0)
    k_param, k_x = jax.random.split(key)
    params = init_lenet_params(k_param)
    packed = pack_lenet_params(params)
    # LeNet's 16*5*5 flatten requires 1x28x28 input; small batch = 2.
    x = jax.random.normal(k_x, (2, 1, 28, 28), jnp.float32)

    out = jax.block_until_ready(lenet_forward(x, packed))
    assert out.shape == (2, 10) and out.dtype == jnp.float32
    print("KERNEL_OK")
</pallas_src>

<mosaic_0001>
module attributes {stable_mosaic.version = 11 : i64} {
  func.func @_conv_relu_pool_kernel(%arg0: memref<25x2048xbf16, #tpu.memory_space<vmem>>, %arg1: memref<6x25xbf16, #tpu.memory_space<vmem>>, %arg2: memref<6x1xf32, #tpu.memory_space<vmem>>, %arg3: memref<6x512xf32, #tpu.memory_space<vmem>>) attributes {dimension_semantics = [], scalar_prefetch = 0 : i64, scratch_operands = 0 : i64, tpu.core_type = #tpu.core_type<tc>} {
    %c0 = arith.constant 0 : index
    %c0_0 = arith.constant 0 : index
    %0 = vector.load %arg1[%c0, %c0_0] : memref<6x25xbf16, #tpu.memory_space<vmem>>, vector<6x25xbf16>
    %c0_1 = arith.constant 0 : index
    %c0_2 = arith.constant 0 : index
    %1 = vector.load %arg0[%c0_1, %c0_2] : memref<25x2048xbf16, #tpu.memory_space<vmem>>, vector<25x2048xbf16>
    %cst = arith.constant dense<0.000000e+00> : vector<6x2048xf32>
    %2 = tpu.matmul %0, %1, %cst {dimension_numbers = #tpu.dot_dimension_numbers<[1], [0], [0], [1], [0, 0, 1, 1], [], []>} : vector<6x25xbf16>, vector<25x2048xbf16>, vector<6x2048xf32> -> vector<6x2048xf32>
    %3 = vector.extract_strided_slice %2 {offsets = [0, 0], sizes = [6, 512], strides = [1, 1]} : vector<6x2048xf32> to vector<6x512xf32>
    %4 = vector.extract_strided_slice %2 {offsets = [0, 512], sizes = [6, 512], strides = [1, 1]} : vector<6x2048xf32> to vector<6x512xf32>
    %5 = arith.maximumf %3, %4 : vector<6x512xf32>
    %6 = vector.extract_strided_slice %2 {offsets = [0, 1024], sizes = [6, 512], strides = [1, 1]} : vector<6x2048xf32> to vector<6x512xf32>
    %7 = vector.extract_strided_slice %2 {offsets = [0, 1536], sizes = [6, 512], strides = [1, 1]} : vector<6x2048xf32> to vector<6x512xf32>
    %8 = arith.maximumf %6, %7 : vector<6x512xf32>
    %9 = arith.maximumf %5, %8 : vector<6x512xf32>
    %c0_3 = arith.constant 0 : index
    %c0_4 = arith.constant 0 : index
    %10 = vector.load %arg2[%c0_3, %c0_4] : memref<6x1xf32, #tpu.memory_space<vmem>>, vector<6x1xf32>
    %11 = vector.broadcast %10 : vector<6x1xf32> to vector<6x512xf32>
    %12 = arith.addf %9, %11 : vector<6x512xf32>
    %cst_5 = arith.constant 0.000000e+00 : f32
    %13 = vector.broadcast %cst_5 : f32 to vector<6x512xf32>
    %14 = arith.maximumf %12, %13 : vector<6x512xf32>
    %c0_6 = arith.constant 0 : index
    %c0_7 = arith.constant 0 : index
    %15 = vector.load %arg3[%c0_6, %c0_7] : memref<6x512xf32, #tpu.memory_space<vmem>>, vector<6x512xf32>
    tpu.vector_store %arg3[%c0_6, %c0_7], %14 {strides = array<i32>} : memref<6x512xf32, #tpu.memory_space<vmem>>, vector<6x512xf32>,
    return
  }
}

module attributes {stable_mosaic.version = 11 : i64} {
  func.func @_conv_relu_pool_kernel(%arg0: memref<150x512xbf16, #tpu.memory_space<vmem>>, %arg1: memref<16x150xbf16, #tpu.memory_space<vmem>>, %arg2: memref<16x1xf32, #tpu.memory_space<vmem>>, %arg3: memref<16x128xf32, #tpu.memory_space<vmem>>) attributes {dimension_semantics = [], scalar_prefetch = 0 : i64, scratch_operands = 0 : i64, tpu.core_type = #tpu.core_type<tc>} {
    %c0 = arith.constant 0 : index
    %c0_0 = arith.constant 0 : index
    %0 = vector.load %arg1[%c0, %c0_0] : memref<16x150xbf16, #tpu.memory_space<vmem>>, vector<16x150xbf16>
    %c0_1 = arith.constant 0 : index
    %c0_2 = arith.constant 0 : index
    %1 = vector.load %arg0[%c0_1, %c0_2] : memref<150x512xbf16, #tpu.memory_space<vmem>>, vector<150x512xbf16>
    %cst = arith.constant dense<0.000000e+00> : vector<16x512xf32>
    %2 = tpu.matmul %0, %1, %cst {dimension_numbers = #tpu.dot_dimension_numbers<[1], [0], [0], [1], [0, 0, 1, 1], [], []>} : vector<16x150xbf16>, vector<150x512xbf16>, vector<16x512xf32> -> vector<16x512xf32>
    %3 = vector.extract_strided_slice %2 {offsets = [0, 0], sizes = [16, 128], strides = [1, 1]} : vector<16x512xf32> to vector<16x128xf32>
    %4 = vector.extract_strided_slice %2 {offsets = [0, 128], sizes = [16, 128], strides = [1, 1]} : vector<16x512xf32> to vector<16x128xf32>
    %5 = arith.maximumf %3, %4 : vector<16x128xf32>
    %6 = vector.extract_strided_slice %2 {offsets = [0, 256], sizes = [16, 128], strides = [1, 1]} : vector<16x512xf32> to vector<16x128xf32>
    %7 = vector.extract_strided_slice %2 {offsets = [0, 384], sizes = [16, 128], strides = [1, 1]} : vector<16x512xf32> to vector<16x128xf32>
    %8 = arith.maximumf %6, %7 : vector<16x128xf32>
    %9 = arith.maximumf %5, %8 : vector<16x128xf32>
    %c0_3 = arith.constant 0 : index
    %c0_4 = arith.constant 0 : index
    %10 = vector.load %arg2[%c0_3, %c0_4] : memref<16x1xf32, #tpu.memory_space<vmem>>, vector<16x1xf32>
    %11 = vector.broadcast %10 : vector<16x1xf32> to vector<16x128xf32>
    %12 = arith.addf %9, %11 : vector<16x128xf32>
    %cst_5 = arith.constant 0.000000e+00 : f32
    %13 = vector.broadcast %cst_5 : f32 to vector<16x128xf32>
    %14 = arith.maximumf %12, %13 : vector<16x128xf32>
    %c0_6 = arith.constant 0 : index
    %c0_7 = arith.constant 0 : index
    %15 = vector.load %arg3[%c0_6, %c0_7] : memref<16x128xf32, #tpu.memory_space<vmem>>, vector<16x128xf32>
    tpu.vector_store %arg3[%c0_6, %c0_7], %14 {strides = array<i32>} : memref<16x128xf32, #tpu.memory_space<vmem>>, vector<16x128xf32>,
    return
  }
}

module attributes {stable_mosaic.version = 11 : i64} {
  func.func @_fc_head_kernel(%arg0: memref<2x400xbf16, #tpu.memory_space<vmem>>, %arg1: memref<400x120xbf16, #tpu.memory_space<vmem>>, %arg2: memref<1x120xf32, #tpu.memory_space<vmem>>, %arg3: memref<120x84xbf16, #tpu.memory_space<vmem>>, %arg4: memref<1x84xf32, #tpu.memory_space<vmem>>, %arg5: memref<84x128xbf16, #tpu.memory_space<vmem>>, %arg6: memref<1x128xf32, #tpu.memory_space<vmem>>, %arg7: memref<2x128xf32, #tpu.memory_space<vmem>>) attributes {dimension_semantics = [], scalar_prefetch = 0 : i64, scratch_operands = 0 : i64, tpu.core_type = #tpu.core_type<tc>} {
    %c0 = arith.constant 0 : index
    %c0_0 = arith.constant 0 : index
    %0 = vector.load %arg0[%c0, %c0_0] : memref<2x400xbf16, #tpu.memory_space<vmem>>, vector<2x400xbf16>
    %c0_1 = arith.constant 0 : index
    %c0_2 = arith.constant 0 : index
    %1 = vector.load %arg1[%c0_1, %c0_2] : memref<400x120xbf16, #tpu.memory_space<vmem>>, vector<400x120xbf16>
    %cst = arith.constant dense<0.000000e+00> : vector<2x120xf32>
    %2 = tpu.matmul %0, %1, %cst {dimension_numbers = #tpu.dot_dimension_numbers<[1], [0], [0], [1], [0, 0, 1, 1], [], []>} : vector<2x400xbf16>, vector<400x120xbf16>, vector<2x120xf32> -> vector<2x120xf32>
    %c0_3 = arith.constant 0 : index
    %c0_4 = arith.constant 0 : index
    %3 = vector.load %arg2[%c0_3, %c0_4] : memref<1x120xf32, #tpu.memory_space<vmem>>, vector<1x120xf32>
    %4 = vector.broadcast %3 : vector<1x120xf32> to vector<2x120xf32>
    %5 = arith.addf %2, %4 : vector<2x120xf32>
    %cst_5 = arith.constant 0.000000e+00 : f32
    %6 = vector.broadcast %cst_5 : f32 to vector<2x120xf32>
    %7 = arith.maximumf %5, %6 : vector<2x120xf32>
    %8 = arith.truncf %7 : vector<2x120xf32> to vector<2x120xbf16>
    %c0_6 = arith.constant 0 : index
    %c0_7 = arith.constant 0 : index
    %9 = vector.load %arg3[%c0_6, %c0_7] : memref<120x84xbf16, #tpu.memory_space<vmem>>, vector<120x84xbf16>
    %cst_8 = arith.constant dense<0.000000e+00> : vector<2x84xf32>
    %10 = tpu.matmul %8, %9, %cst_8 {dimension_numbers = #tpu.dot_dimension_numbers<[1], [0], [0], [1], [0, 0, 1, 1], [], []>} : vector<2x120xbf16>, vector<120x84xbf16>, vector<2x84xf32> -> vector<2x84xf32>
    %c0_9 = arith.constant 0 : index
    %c0_10 = arith.constant 0 : index
    %11 = vector.load %arg4[%c0_9, %c0_10] : memref<1x84xf32, #tpu.memory_space<vmem>>, vector<1x84xf32>
    %12 = vector.broadcast %11 : vector<1x84xf32> to vector<2x84xf32>
    %13 = arith.addf %10, %12 : vector<2x84xf32>
    %cst_11 = arith.constant 0.000000e+00 : f32
    %14 = vector.broadcast %cst_11 : f32 to vector<2x84xf32>
    %15 = arith.maximumf %13, %14 : vector<2x84xf32>
    %16 = arith.truncf %15 : vector<2x84xf32> to vector<2x84xbf16>
    %c0_12 = arith.constant 0 : index
    %c0_13 = arith.constant 0 : index
    %17 = vector.load %arg5[%c0_12, %c0_13] : memref<84x128xbf16, #tpu.memory_space<vmem>>, vector<84x128xbf16>
    %cst_14 = arith.constant dense<0.000000e+00> : vector<2x128xf32>
    %18 = tpu.matmul %16, %17, %cst_14 {dimension_numbers = #tpu.dot_dimension_numbers<[1], [0], [0], [1], [0, 0, 1, 1], [], []>} : vector<2x84xbf16>, vector<84x128xbf16>, vector<2x128xf32> -> vector<2x128xf32>
    %c0_15 = arith.constant 0 : index
    %c0_16 = arith.constant 0 : index
    %19 = vector.load %arg6[%c0_15, %c0_16] : memref<1x128xf32, #tpu.memory_space<vmem>>, vector<1x128xf32>
    %20 = vector.broadcast %19 : vector<1x128xf32> to vector<2x128xf32>
    %21 = arith.addf %18, %20 : vector<2x128xf32>
    %c0_17 = arith.constant 0 : index
    %c0_18 = arith.constant 0 : index
    %22 = vector.load %arg7[%c0_17, %c0_18] : memref<2x128xf32, #tpu.memory_space<vmem>>, vector<2x128xf32>
    tpu.vector_store %arg7[%c0_17, %c0_18], %21 {strides = array<i32>} : memref<2x128xf32, #tpu.memory_space<vmem>>, vector<2x128xf32>,
    return
  }
}

</mosaic_0001>

<bundles_post_ra>
// kernel: lenet_forward.3
= control target key start
LH: loop header
LB: loop body
LE: loop exit
PB: predicated region body
PF: predicated region fallthrough
CT: control target
= control target key end

     0   :  { %vm196_vm0 = vcmask 1043456   ;;  %vm197_vm1 = vcmask 1044480   ;;  %v653_v3 = vmov 65535   ;;  %v654_v5 = vmov 0   ;;  %s834_s0 = inlined_call_operand.vmem [shape: bf16[25,2048], index: 0, kind: input, shape index: {}]   ;;  %s835_s1 = inlined_call_operand.vmem [shape: bf16[6,25], index: 1, kind: input, shape index: {}]   ;;  %s836_s2 = inlined_call_operand.vmem [shape: f32[6,1], index: 2, kind: input, shape index: {}]   ;;  %s837_s3 = inlined_call_operand.vmem [shape: f32[6,512], index: 3, kind: output, shape index: {}]  }
   0x1   :  { %v16_v0 = vld [vmem:[%s834_s0] sm:$0xff]  ;;  %v17_v2 = vld [vmem:[%s834_s0 + $0x8] sm:$0xff]  ;;  %v198_v4 = vsel %vm196_vm0, 4294967295, %v653_v3  ;;  %280 = vmatprep.mubr.bf16.mxu0 %v654_v5  ;;  %321 = vmatprep.mubr.bf16.mxu1 %v654_v5  ;;  %v18_v20 = vld [vmem:[%s834_s0 + $0x10] sm:$0xff]  ;;  %vm192_vm2 = vcmask 203776  }
   0x2   :  { %v24_v1 = vld [vmem:[%s834_s0 + $0x40] sm:$0xff]  ;;  %v25_v7 = vld [vmem:[%s834_s0 + $0x48] sm:$0xff]  ;;  %v695_v11 = vsel %vm197_vm1, %v198_v4, 0  ;;  %652 = vset.pattern.permute.xlu0 %v654_v5  ;;  %v26_v21 = vld [vmem:[%s834_s0 + $0x50] sm:$0xff] }
   0x3   :  { %v611_v6 = vcombine.high %v16_v0, %v24_v1  ;;  %v610_v8 = vcombine.low %v16_v0, %v24_v1  ;;  %v32_v9 = vld [vmem:[%s834_s0 + $0x80] sm:$0xff]  ;;  %v613_v12 = vcombine.high %v17_v2, %v25_v7  ;;  %v612_v13 = vcombine.low %v17_v2, %v25_v7  ;;  %v33_v15 = vld [vmem:[%s834_s0 + $0x88] sm:$0xff]  ;;  %v19_v22 = vld [vmem:[%s834_s0 + $0x18] sm:$0xff] }
   0x4   :  { %v40_v10 = vld [vmem:[%s834_s0 + $0xc0] sm:$0x11]  ;;  %v41_v16 = vld [vmem:[%s834_s0 + $0xc8] sm:$0x11]  ;;  %v27_v25 = vld [vmem:[%s834_s0 + $0x58] sm:$0xff]  ;;  %v615_v30 = vcombine.high %v18_v20, %v26_v21  ;;  %v614_v37 = vcombine.low %v18_v20, %v26_v21 }
   0x5   :  { %v627_v14 = vcombine.high %v32_v9, %v40_v10  ;;  %v626_v17 = vcombine.low %v32_v9, %v40_v10  ;;  %248 = vmatprep.subr.bf16.mxu0 %v611_v6  ;;  %v629_v18 = vcombine.high %v33_v15, %v41_v16  ;;  %v628_v19 = vcombine.low %v33_v15, %v41_v16  ;;  %v34_v26 = vld [vmem:[%s834_s0 + $0x90] sm:$0xff]  ;;  %v35_v31 = vld [vmem:[%s834_s0 + $0x98] sm:$0xff]  ;;  %v735_v36 = vld [vmem:[%s835_s1] sm:$0x7] }
   0x6   :  { %289 = vmatprep.subr.bf16.mxu1 %v613_v12  ;;  %249 = vmatpush1.bf16.msra.mxu0 %v610_v8  ;;  %v42_v27 = vld [vmem:[%s834_s0 + $0xd0] sm:$0x11]  ;;  %v43_v32 = vld [vmem:[%s834_s0 + $0xd8] sm:$0x11]  ;;  %v617_v33 = vcombine.high %v19_v22, %v27_v25  ;;  %v616_v39 = vcombine.low %v19_v22, %v27_v25  ;;  %v20_v42 = vld [vmem:[%s834_s0 + $0x20] sm:$0xff] }
   0x7   :  { %v204_v23 = vand.u32 %v627_v14, %v695_v11  ;;  %v201_v24 = vand.u32 %v626_v17, %v695_v11  ;;  %290 = vmatpush1.bf16.msra.mxu1 %v612_v13  ;;  %v210_v28 = vand.u32 %v629_v18, %v695_v11  ;;  %v207_v29 = vand.u32 %v628_v19, %v695_v11  ;;  %v28_v43 = vld [vmem:[%s834_s0 + $0x60] sm:$0xff]  ;;  %v21_v45 = vld [vmem:[%s834_s0 + $0x28] sm:$0xff]  ;;  %v22_v63 = vld [vmem:[%s834_s0 + $0x30] sm:$0xff] }
   0x8   :  { %v631_v34 = vcombine.high %v34_v26, %v42_v27  ;;  %v633_v35 = vcombine.high %v35_v31, %v43_v32  ;;  %v630_v38 = vcombine.low %v34_v26, %v42_v27  ;;  %v632_v41 = vcombine.low %v35_v31, %v43_v32  ;;  %v36_v46 = vld [vmem:[%s834_s0 + $0xa0] sm:$0xff]  ;;  %v29_v48 = vld [vmem:[%s834_s0 + $0x68] sm:$0xff]  ;;  %v30_v0 = vld [vmem:[%s834_s0 + $0x70] sm:$0xff] }
   0x9   :  { %250 = vmatprep.subr.bf16.mxu0 %v204_v23  ;;  %291 = vmatprep.subr.bf16.mxu1 %v210_v28  ;;  %v44_v47 = vld [vmem:[%s834_s0 + $0xe0] sm:$0x11]  ;;  %v37_v49 = vld [vmem:[%s834_s0 + $0xa8] sm:$0xff]  ;;  %v619_v54 = vcombine.high %v20_v42, %v28_v43  ;;  %v621_v56 = vcombine.high %v21_v45, %v29_v48  ;;  %v618_v58 = vcombine.low %v20_v42, %v28_v43  ;;  %v23_v2 = vld [vmem:[%s834_s0 + $0x38] sm:$0xff] }
   0xa   :  { %251 = vmatpush1.bf16.msra.mxu0 %v201_v24  ;;  %v216_v40 = vand.u32 %v631_v34, %v695_v11  ;;  %v222_v44 = vand.u32 %v633_v35, %v695_v11  ;;  %v45_v50 = vld [vmem:[%s834_s0 + $0xe8] sm:$0x11]  ;;  %v213_v51 = vand.u32 %v630_v38, %v695_v11  ;;  %v588_v52 = vld [vmem:[%s836_s2] sm:$0x3f]  ;;  %v219_v53 = vand.u32 %v632_v41, %v695_v11  ;;  %v38_v3 = vld [vmem:[%s834_s0 + $0xb0] sm:$0xff] }
   0xb   :  { %292 = vmatpush1.bf16.msra.mxu1 %v207_v29  ;;  %330 = vmatprep.subr.bf16.mxu0 %v615_v30  ;;  %v635_v55 = vcombine.high %v36_v46, %v44_v47  ;;  %v637_v57 = vcombine.high %v37_v49, %v45_v50  ;;  %v634_v59 = vcombine.low %v36_v46, %v44_v47  ;;  %v46_v4 = vld [vmem:[%s834_s0 + $0xf0] sm:$0x11]  ;;  %v31_v6 = vld [vmem:[%s834_s0 + $0x78] sm:$0xff] }
   0xc   :  { %371 = vmatprep.subr.bf16.mxu1 %v617_v33  ;;  %591 = vperm.xlu0 %652, %v588_v52   ;;  %v620_v60 = vcombine.low %v21_v45, %v29_v48  ;;  %v636_v62 = vcombine.low %v37_v49, %v45_v50  ;;  %v39_v7 = vld [vmem:[%s834_s0 + $0xb8] sm:$0xff]  ;;  %v623_v12 = vcombine.high %v22_v63, %v30_v0 }
   0xd   :  { %642 = vmatmul.mubr.msk.bf16.vlgmr.msra.gmra.mrb[0].mxu0 %vm192_vm2, %v735_v36  ;;  %v228_v61 = vand.u32 %v635_v55, %v695_v11  ;;  %v234_v1 = vand.u32 %v637_v57, %v695_v11  ;;  %v47_v8 = vld [vmem:[%s834_s0 + $0xf8] sm:$0x11]  ;;  %v225_v9 = vand.u32 %v634_v59, %v695_v11  ;;  %v639_v13 = vcombine.high %v38_v3, %v46_v4 }
   0xe   :  { %643 = vmatmul.mubr.msk.bf16.vlgmr.msra.gmra.mrb[0].mxu1 %vm192_vm2, %v735_v36  ;;  %331 = vmatpush1.bf16.msra.mxu0 %v614_v37  ;;  %v231_v10 = vand.u32 %v636_v62, %v695_v11  ;;  %v625_v14 = vcombine.high %v23_v2, %v31_v6  ;;  %v641_v15 = vcombine.high %v39_v7, %v47_v8 }
   0xf   :  { %372 = vmatpush1.bf16.msra.mxu1 %v616_v39  ;;  %332 = vmatprep.subr.bf16.mxu0 %v216_v40  ;;  %v622_v16 = vcombine.low %v22_v63, %v30_v0  ;;  %v638_v17 = vcombine.low %v38_v3, %v46_v4  ;;  %v624_v18 = vcombine.low %v23_v2, %v31_v6 }
  0x10   :  { %373 = vmatprep.subr.bf16.mxu1 %v222_v44  ;;  %362 = vmatprep.mubr.bf16.mxu0 %v654_v5  ;;  %v240_v19 = vand.u32 %v639_v13, %v695_v11  ;;  %v640_v20 = vcombine.low %v39_v7, %v47_v8  ;;  %v246_v21 = vand.u32 %v641_v15, %v695_v11 }
  0x11   :  { %403 = vmatprep.mubr.bf16.mxu1 %v654_v5  ;;  %v237_v22 = vand.u32 %v638_v17, %v695_v11 }
  0x12   :  { %333 = vmatpush1.bf16.msra.mxu0 %v213_v51  ;;  %v243_v23 = vand.u32 %v640_v20, %v695_v11 }
  0x13   :  { %374 = vmatpush1.bf16.msra.mxu1 %v219_v53  ;;  %412 = vmatprep.subr.bf16.mxu0 %v619_v54 }
  0x14   :  { %453 = vmatprep.subr.bf16.mxu1 %v621_v56 }
  0x15   :  { %644 = vmatmul.mubr.msk.bf16.vlgmr.msra.gmra.mrb[4].mxu0 %vm192_vm2, %v735_v36 }
  0x16   :  { %645 = vmatmul.mubr.msk.bf16.vlgmr.msra.gmra.mrb[4].mxu1 %vm192_vm2, %v735_v36  ;;  %413 = vmatpush1.bf16.msra.mxu0 %v618_v58 }
  0x17   :  { %454 = vmatpush1.bf16.msra.mxu1 %v620_v60  ;;  %414 = vmatprep.subr.bf16.mxu0 %v228_v61 }
  0x18   :  { %455 = vmatprep.subr.bf16.mxu1 %v234_v1  ;;  %444 = vmatprep.mubr.bf16.mxu0 %v654_v5 }
  0x19   :  { %485 = vmatprep.mubr.bf16.mxu1 %v654_v5 }
  0x1a   :  { %415 = vmatpush1.bf16.msra.mxu0 %v225_v9 }
  0x1b   :  { %456 = vmatpush1.bf16.msra.mxu1 %v231_v10  ;;  %494 = vmatprep.subr.bf16.mxu0 %v623_v12 }
  0x1c   :  { %535 = vmatprep.subr.bf16.mxu1 %v625_v14 }
  0x1d   :  { %646 = vmatmul.mubr.msk.bf16.vlgmr.msra.gmra.mrb[8].mxu0 %vm192_vm2, %v735_v36 }
  0x1e   :  { %647 = vmatmul.mubr.msk.bf16.vlgmr.msra.gmra.mrb[8].mxu1 %vm192_vm2, %v735_v36  ;;  %495 = vmatpush1.bf16.msra.mxu0 %v622_v16 }
  0x1f   :  { %536 = vmatpush1.bf16.msra.mxu1 %v624_v18  ;;  %496 = vmatprep.subr.bf16.mxu0 %v240_v19 }
  0x20   :  { %537 = vmatprep.subr.bf16.mxu1 %v246_v21  ;;  %526 = vmatprep.mubr.bf16.mxu0 %v654_v5 }
  0x21   :  { %567 = vmatprep.mubr.bf16.mxu1 %v654_v5 }
  0x22   :  { %497 = vmatpush1.bf16.msra.mxu0 %v237_v22 }
  0x23   :  { %538 = vmatpush1.bf16.msra.mxu1 %v243_v23 }
  0x25   :  { %648 = vmatmul.mubr.msk.bf16.vlgmr.msra.gmra.mrb[12].mxu0 %vm192_vm2, %v735_v36 }
  0x26   :  { %649 = vmatmul.mubr.msk.bf16.vlgmr.msra.gmra.mrb[12].mxu1 %vm192_vm2, %v735_v36 }
  0x8b   :  { %v592_v51 = vpop.permute.xlu0 %591 }
  0xe0   :  { %v282_v24 = vpop.f32.mrb[0].mxu0 }
  0xe1   :  { %v323_v25 = vpop.f32.mrb[0].mxu1  ;;  %v284_v26 = vpop.f32.mrb[1].mxu0 }
  0xe2   :  { %v325_v27 = vpop.f32.mrb[1].mxu1  ;;  %v286_v28 = vpop.f32.mrb[2].mxu0 }
  0xe3   :  { %v327_v29 = vpop.f32.mrb[2].mxu1  ;;  %v287_v11 = vpop.f32.mrb[3].mxu0 }
  0xe4   :  { %v328_v30 = vpop.f32.mrb[3].mxu1 }
  0xe8   :  { %v364_v31 = vpop.f32.mrb[4].mxu0 }
  0xe9   :  { %v576_v32 = vmax.f32 %v282_v24, %v364_v31  ;;  %v405_v33 = vpop.f32.mrb[4].mxu1  ;;  %v366_v5 = vpop.f32.mrb[5].mxu0 }
  0xea   :  { %v578_v34 = vmax.f32 %v323_v25, %v405_v33  ;;  %v577_v35 = vmax.f32 %v284_v26, %v366_v5  ;;  %v407_v37 = vpop.f32.mrb[5].mxu1  ;;  %v368_v38 = vpop.f32.mrb[6].mxu0 }
  0xeb   :  { %v579_v39 = vmax.f32 %v325_v27, %v407_v37  ;;  %v409_v40 = vpop.f32.mrb[6].mxu1  ;;  %v369_v41 = vpop.f32.mrb[7].mxu0 }
  0xec   :  { %v410_v36 = vpop.f32.mrb[7].mxu1 }
  0xf0   :  { %v446_v42 = vpop.f32.mrb[8].mxu0 }
  0xf1   :  { %v487_v43 = vpop.f32.mrb[8].mxu1  ;;  %v448_v44 = vpop.f32.mrb[9].mxu0 }
  0xf2   :  { %v489_v45 = vpop.f32.mrb[9].mxu1  ;;  %v450_v46 = vpop.f32.mrb[10].mxu0 }
  0xf3   :  { %v491_v47 = vpop.f32.mrb[10].mxu1  ;;  %v451_v48 = vpop.f32.mrb[11].mxu0 }
  0xf4   :  { %v492_v49 = vpop.f32.mrb[11].mxu1 }
  0xf8   :  { %v528_v50 = vpop.f32.mrb[12].mxu0 }
  0xf9   :  { %v580_v52 = vmax.f32 %v446_v42, %v528_v50  ;;  %v569_v53 = vpop.f32.mrb[12].mxu1  ;;  %v530_v54 = vpop.f32.mrb[13].mxu0 }
  0xfa   :  { %v582_v55 = vmax.f32 %v487_v43, %v569_v53  ;;  %v581_v56 = vmax.f32 %v448_v44, %v530_v54  ;;  %v571_v57 = vpop.f32.mrb[13].mxu1  ;;  %v532_v58 = vpop.f32.mrb[14].mxu0 }
  0xfb   :  { %v584_v59 = vmax.f32 %v576_v32, %v580_v52  ;;  %v583_v60 = vmax.f32 %v489_v45, %v571_v57  ;;  %v573_v61 = vpop.f32.mrb[14].mxu1  ;;  %v533_v62 = vpop.f32.mrb[15].mxu0 }
  0xfc   :  { %v586_v63 = vmax.f32 %v578_v34, %v582_v55  ;;  %v585_v0 = vmax.f32 %v577_v35, %v581_v56  ;;  %v574_v1 = vpop.f32.mrb[15].mxu1 }
  0xfd   :  { %v587_v2 = vmax.f32 %v579_v39, %v583_v60  ;;  %v594_v3 = vadd.f32 %v592_v51, %v584_v59 }
  0xfe   :  { %v595_v4 = vadd.f32 %v592_v51, %v585_v0  ;;  %v596_v6 = vadd.f32 %v592_v51, %v586_v63 }
  0xff   :  { %v597_v7 = vadd.f32 %v592_v51, %v587_v2  ;;  %v598_v8 = vmax.f32 %v594_v3, 0.0 }
 0x100   :  { %v599_v9 = vmax.f32 %v595_v4, 0.0  ;;  %v600_v10 = vmax.f32 %v596_v6, 0.0 }
 0x101   :  { %v601_v12 = vmax.f32 %v597_v7, 0.0  ;;  %602 = vst [vmem:[%s837_s3] sm:$0x3f] %v598_v8 }
 0x102   :  { %603 = vst [vmem:[%s837_s3 + $0x8] sm:$0x3f] %v599_v9  ;;  %604 = vst [vmem:[%s837_s3 + $0x10] sm:$0x3f] %v600_v10 }
 0x103   :  { %605 = vst [vmem:[%s837_s3 + $0x18] sm:$0x3f] %v601_v12 }

// kernel: lenet_forward.4
= control target key start
LH: loop header
LB: loop body
LE: loop exit
PB: predicated region body
PF: predicated region fallthrough
CT: control target
= control target key end

     0   :  { %v494_v1 = vmov 0   ;;  %vm254_vm0 = vcmask 179200   ;;  %vm258_vm1 = vcmask 1042432   ;;  %s647_s0 = inlined_call_operand.vmem [shape: bf16[150,512], index: 0, kind: input, shape index: {}]   ;;  %s648_s1 = inlined_call_operand.vmem [shape: bf16[16,150], index: 1, kind: input, shape index: {}]   ;;  %s649_s2 = inlined_call_operand.vmem [shape: f32[16,1], index: 2, kind: input, shape index: {}]   ;;  %s650_s3 = inlined_call_operand.vmem [shape: f32[16,128], index: 3, kind: output, shape index: {}]  }
   0x1   :  { %v433_v0 = vld [vmem:[%s647_s0 + $0x4] ss:$16 sps:$4 sm:$0xff]   ;;  %432 = vset.pattern.permute.xlu0 %v494_v1  ;;  %v435_v2 = vld [vmem:[%s647_s0 + $0xc] ss:$16 sps:$4 sm:$0xff]   ;;  %v437_v3 = vld [vmem:[%s647_s0] ss:$16 sps:$4 sm:$0xff]  }
   0x2   :  { %271 = vmatprep.subr.bf16.mxu0 %v433_v0  ;;  %v438_v4 = vld [vmem:[%s647_s0 + $0x8] ss:$16 sps:$4 sm:$0xff]   ;;  %314 = vmatprep.subr.bf16.mxu1 %v435_v2  ;;  %v439_v5 = vld [vmem:[%s647_s0 + $0x24] ss:$16 sps:$4 sm:$0xff]   ;;  %v441_v6 = vld [vmem:[%s647_s0 + $0x2c] ss:$16 sps:$4 sm:$0xff]  }
   0x3   :  { %272 = vmatpush1.bf16.msra.mxu0 %v437_v3  ;;  %315 = vmatpush1.bf16.msra.mxu1 %v438_v4  ;;  %v443_v7 = vld [vmem:[%s647_s0 + $0x20] ss:$16 sps:$4 sm:$0xff]   ;;  %v444_v8 = vld [vmem:[%s647_s0 + $0x28] ss:$16 sps:$4 sm:$0xff]   ;;  %v445_v9 = vld [vmem:[%s647_s0 + $0x44] ss:$16 sps:$4 sm:$0xff]  }
   0x4   :  { %273 = vmatprep.subr.bf16.mxu0 %v439_v5  ;;  %316 = vmatprep.subr.bf16.mxu1 %v441_v6  ;;  %v447_v10 = vld [vmem:[%s647_s0 + $0x4c] ss:$16 sps:$4 sm:$0xff]   ;;  %v449_v11 = vld [vmem:[%s647_s0 + $0x40] ss:$16 sps:$4 sm:$0xff]   ;;  %v450_v12 = vld [vmem:[%s647_s0 + $0x48] ss:$16 sps:$4 sm:$0xff]  }
   0x5   :  { %v451_v13 = vld [vmem:[%s647_s0 + $0x64] ss:$16 sps:$4 sm:$0xff]   ;;  %v453_v14 = vld [vmem:[%s647_s0 + $0x6c] ss:$16 sps:$4 sm:$0xff]   ;;  %v455_v15 = vld [vmem:[%s647_s0 + $0x60] ss:$16 sps:$4 sm:$0xff]  }
   0x6   :  { %v456_v16 = vld [vmem:[%s647_s0 + $0x68] ss:$16 sps:$4 sm:$0xff]   ;;  %v457_v17 = vld [vmem:[%s647_s0 + $0x84] ss:$16 sps:$4 sm:$0xff]   ;;  %v459_v18 = vld [vmem:[%s647_s0 + $0x8c] ss:$16 sps:$4 sm:$0xff]  }
   0x7   :  { %274 = vmatpush1.bf16.msra.mxu0 %v443_v7  ;;  %317 = vmatpush1.bf16.msra.mxu1 %v444_v8  ;;  %v461_v19 = vld [vmem:[%s647_s0 + $0x80] ss:$16 sps:$4 sm:$0xff]   ;;  %v462_v20 = vld [vmem:[%s647_s0 + $0x88] ss:$16 sps:$4 sm:$0xff]   ;;  %v463_v21 = vld [vmem:[%s647_s0 + $0xa4] ss:$16 sps:$4 sm:$0xff]  }
   0x8   :  { %275 = vmatprep.subr.bf16.mxu0 %v445_v9  ;;  %318 = vmatprep.subr.bf16.mxu1 %v447_v10  ;;  %v465_v22 = vld [vmem:[%s647_s0 + $0xac] ss:$16 sps:$4 sm:$0xff]   ;;  %v467_v23 = vld [vmem:[%s647_s0 + $0xa0] ss:$16 sps:$4 sm:$0xff]   ;;  %v468_v24 = vld [vmem:[%s647_s0 + $0xa8] ss:$16 sps:$4 sm:$0xff]  }
   0x9   :  { %v469_v25 = vld [vmem:[%s647_s0 + $0xc4] ss:$16 sps:$4 sm:$0xff]   ;;  %v471_v26 = vld [vmem:[%s647_s0 + $0xcc] ss:$16 sps:$4 sm:$0xff]   ;;  %v473_v27 = vld [vmem:[%s647_s0 + $0xc0] ss:$16 sps:$4 sm:$0xff]  }
   0xa   :  { %v474_v28 = vld [vmem:[%s647_s0 + $0xc8] ss:$16 sps:$4 sm:$0xff]   ;;  %v475_v29 = vld [vmem:[%s647_s0 + $0xe4] ss:$16 sps:$4 sm:$0xff]   ;;  %v477_v30 = vld [vmem:[%s647_s0 + $0xec] ss:$16 sps:$4 sm:$0xff]  }
   0xb   :  { %276 = vmatpush1.bf16.msra.mxu0 %v449_v11  ;;  %319 = vmatpush1.bf16.msra.mxu1 %v450_v12  ;;  %v493_v31 = vld [vmem:[%s648_s1 + $0x4] ss:$8 sps:$4 sm:$0xff]   ;;  %v479_v33 = vld [vmem:[%s647_s0 + $0xe0] ss:$16 sps:$4 sm:$0xff]   ;;  %v480_v34 = vld [vmem:[%s647_s0 + $0xe8] ss:$16 sps:$4 sm:$0xff]  }
   0xc   :  { %277 = vmatprep.subr.bf16.mxu0 %v451_v13  ;;  %320 = vmatprep.subr.bf16.mxu1 %v453_v14  ;;  %v363_v32 = vld [vmem:[%s649_s2] sm:$0xff]  ;;  %v483_v36 = vld [vmem:[%s647_s0 + $0x10c] ss:$16 sps:$4 sm:$0xff]   ;;  %v486_v41 = vld [vmem:[%s647_s0 + $0x108] ss:$16 sps:$4 sm:$0xff]  }
   0xd   :  { %428 = vmatprep.mubr.msk.bf16.mxu0 %vm254_vm0, %v493_v31  ;;  %430 = vmatprep.mubr.msk.bf16.mxu1 %vm254_vm0, %v493_v31  ;;  %v481_v35 = vld [vmem:[%s647_s0 + $0x104] ss:$16 sps:$4 sm:$0xff]   ;;  %v54_v38 = vld [vmem:[%s647_s0 + $0x128] sm:$0x77]  ;;  %v485_v40 = vld [vmem:[%s647_s0 + $0x100] ss:$16 sps:$4 sm:$0xff]  }
   0xe   :  { %v53_v37 = vld [vmem:[%s647_s0 + $0x120] sm:$0x77]  ;;  %367 = vperm.xlu0 %432, %v363_v32   ;;  %v364_v39 = vld [vmem:[%s649_s2 + $0x8] sm:$0xff]  ;;  %v426_v43 = vcombine.high %v54_v38, %v54_v38  ;;  %v425_v45 = vcombine.low %v54_v38, %v54_v38 }
   0xf   :  { %278 = vmatpush1.bf16.msra.mxu0 %v455_v15  ;;  %321 = vmatpush1.bf16.msra.mxu1 %v456_v16  ;;  %v424_v42 = vcombine.high %v53_v37, %v53_v37  ;;  %v423_v44 = vcombine.low %v53_v37, %v53_v37  ;;  %v491_v48 = vld [vmem:[%s648_s1] ss:$8 sps:$4 sm:$0xff]  }
  0x10   :  { %279 = vmatprep.subr.bf16.mxu0 %v457_v17  ;;  %322 = vmatprep.subr.bf16.mxu1 %v459_v18  ;;  %v266_v47 = vsel %vm258_vm1, %v425_v45, 0 }
  0x11   :  { %v260_v46 = vsel %vm258_vm1, %v423_v44, 0 }
  0x12   :  { %372 = vperm.xlu0 %432, %v364_v39  }
  0x13   :  { %280 = vmatpush1.bf16.msra.mxu0 %v461_v19  ;;  %323 = vmatpush1.bf16.msra.mxu1 %v462_v20 }
  0x14   :  { %281 = vmatprep.subr.bf16.mxu0 %v463_v21  ;;  %324 = vmatprep.subr.bf16.mxu1 %v465_v22 }
  0x17   :  { %282 = vmatpush1.bf16.msra.mxu0 %v467_v23  ;;  %325 = vmatpush1.bf16.msra.mxu1 %v468_v24 }
  0x18   :  { %283 = vmatprep.subr.bf16.mxu0 %v469_v25  ;;  %326 = vmatprep.subr.bf16.mxu1 %v471_v26 }
  0x1b   :  { %284 = vmatpush1.bf16.msra.mxu0 %v473_v27  ;;  %327 = vmatpush1.bf16.msra.mxu1 %v474_v28 }
  0x1c   :  { %285 = vmatprep.subr.bf16.mxu0 %v475_v29  ;;  %328 = vmatprep.subr.bf16.mxu1 %v477_v30 }
  0x1f   :  { %286 = vmatpush1.bf16.msra.mxu0 %v479_v33  ;;  %329 = vmatpush1.bf16.msra.mxu1 %v480_v34 }
  0x20   :  { %287 = vmatprep.subr.bf16.mxu0 %v481_v35  ;;  %330 = vmatprep.subr.bf16.mxu1 %v483_v36 }
  0x23   :  { %288 = vmatpush1.bf16.msra.mxu0 %v485_v40  ;;  %331 = vmatpush1.bf16.msra.mxu1 %v486_v41 }
  0x24   :  { %427 = vmatprep.subr.msk.bf16.mxu0 %vm258_vm1, %v424_v42  ;;  %429 = vmatprep.subr.msk.bf16.mxu1 %vm258_vm1, %v426_v43 }
  0x27   :  { %290 = vmatpush1.bf16.msra.mxu0 %v260_v46  ;;  %333 = vmatpush1.bf16.msra.mxu1 %v266_v47 }
  0x2a   :  { %304 = vmatmul.mubr.bf16.vlgmr.msra.gmra.mrb[0].mxu0 %v491_v48  ;;  %347 = vmatmul.mubr.bf16.vlgmr.msra.gmra.mrb[0].mxu1 %v491_v48 }
  0x8d   :  { %v368_v49 = vpop.permute.xlu0 %367 }
  0x91   :  { %v373_v1 = vpop.permute.xlu0 %372 }
  0xfd   :  { %v305_v50 = vpop.f32.mrb[0].mxu0  ;;  %v348_v51 = vpop.f32.mrb[0].mxu1 }
  0xfe   :  { %v307_v52 = vpop.f32.mrb[1].mxu0  ;;  %v350_v53 = vpop.f32.mrb[1].mxu1 }
  0xff   :  { %v357_v54 = vmax.f32 %v305_v50, %v307_v52  ;;  %v359_v55 = vmax.f32 %v348_v51, %v350_v53  ;;  %v309_v56 = vpop.f32.mrb[2].mxu0  ;;  %v352_v57 = vpop.f32.mrb[2].mxu1 }
 0x100   :  { %v311_v58 = vpop.f32.mrb[3].mxu0  ;;  %v354_v59 = vpop.f32.mrb[3].mxu1 }
 0x101   :  { %v361_v60 = vmax.f32 %v357_v54, %v359_v55  ;;  %v358_v61 = vmax.f32 %v309_v56, %v311_v58  ;;  %v360_v62 = vmax.f32 %v352_v57, %v354_v59 }
 0x103   :  { %v375_v63 = vadd.f32 %v368_v49, %v361_v60  ;;  %v362_v0 = vmax.f32 %v358_v61, %v360_v62 }
 0x105   :  { %v377_v2 = vmax.f32 %v375_v63, 0.0  ;;  %v376_v3 = vadd.f32 %v373_v1, %v362_v0 }
 0x107   :  { %379 = vst [vmem:[%s650_s3] sm:$0xff] %v377_v2  ;;  %v378_v4 = vmax.f32 %v376_v3, 0.0 }
 0x109   :  { %380 = vst [vmem:[%s650_s3 + $0x8] sm:$0xff] %v378_v4 }

// kernel: lenet_forward.5
= control target key start
LH: loop header
LB: loop body
LE: loop exit
PB: predicated region body
PF: predicated region fallthrough
CT: control target
= control target key end

     0   :  { %v769_v1 = vmov 0   ;;  %v98_v20 = vlaneseq  ;;  %v770_v25 = vmov 1966171168   ;;  %vm264_vm0 = vcmask 130048   ;;  %s980_s0 = inlined_call_operand.vmem [shape: bf16[2,400], index: 0, kind: input, shape index: {}]   ;;  %s981_s1 = inlined_call_operand.vmem [shape: bf16[400,120], index: 1, kind: input, shape index: {}]   ;;  %s982_s2 = inlined_call_operand.vmem [shape: f32[1,120], index: 2, kind: input, shape index: {}]   ;;  %s983_s3 = inlined_call_operand.vmem [shape: bf16[120,84], index: 3, kind: input, shape index: {}]   ;;  %s984_s4 = inlined_call_operand.vmem [shape: f32[1,84], index: 4, kind: input, shape index: {}]   ;;  %s985_s5 = inlined_call_operand.vmem [shape: bf16[84,128], index: 5, kind: input, shape index: {}]   ;;  %s986_s6 = inlined_call_operand.vmem [shape: f32[1,128], index: 6, kind: input, shape index: {}]   ;;  %s987_s7 = inlined_call_operand.hbm [shape: f32[2,128], index: 7, kind: output, shape index: {}]  }
   0x1   :  { %v706_v0 = vld [vmem:[%s981_s1 + $0x40] sm:$0xff]   ;;  %308 = vmatprep.subr.bf16.mxu1 %v769_v1  ;;  %v709_v4 = vld [vmem:[%s981_s1 + $0x48] sm:$0xff]   ;;  %v712_v7 = vld [vmem:[%s981_s1 + $0x50] sm:$0xff]   ;;  %v96_v26 = vunpack.c.l.s4 %v770_v25  ;;  %v771_v38 = vmov 0.0  }
   0x2   :  { %v707_v2 = vld [vmem:[%s981_s1 + $0x80] sm:$0xff]   ;;  %627 = vmatprep.subr.bf16.mxu0 %v706_v0  ;;  %v710_v5 = vld [vmem:[%s981_s1 + $0x88] sm:$0xff]   ;;  %v713_v8 = vld [vmem:[%s981_s1 + $0x90] sm:$0xff]   ;;  %v99_v27 = vshrl.u32 %v98_v20, 7 }
   0x3   :  { %v708_v3 = vld [vmem:[%s981_s1] sm:$0xff]   ;;  %309 = vmatpush1.bf16.msra.mxu1 %v707_v2  ;;  %v711_v6 = vld [vmem:[%s981_s1 + $0x8] sm:$0xff]   ;;  %v714_v9 = vld [vmem:[%s981_s1 + $0x10] sm:$0xff]   ;;  %v97_v30 = vunpack.c.0.s8 %v96_v26 }
   0x4   :  { %628 = vmatpush3.bf16.msra.mxu0 %v708_v3  ;;  %310 = vmatprep.subr.bf16.mxu1 %v769_v1  ;;  %v715_v10 = vld [vmem:[%s981_s1 + $0x58] sm:$0xff]   ;;  %v718_v13 = vld [vmem:[%s981_s1 + $0x60] sm:$0xff]   ;;  %v721_v16 = vld [vmem:[%s981_s1 + $0x68] sm:$0xff]  }
   0x5   :  { %629 = vmatprep.subr.bf16.mxu0 %v709_v4  ;;  %v716_v11 = vld [vmem:[%s981_s1 + $0x98] sm:$0xff]   ;;  %v719_v14 = vld [vmem:[%s981_s1 + $0xa0] sm:$0xff]   ;;  %v722_v17 = vld [vmem:[%s981_s1 + $0xa8] sm:$0xff]   ;;  %v100_v32 = vsub.s32 %v97_v30, %v99_v27 }
   0x6   :  { %v717_v12 = vld [vmem:[%s981_s1 + $0x18] sm:$0xff]   ;;  %v720_v15 = vld [vmem:[%s981_s1 + $0x20] sm:$0xff]   ;;  %v723_v18 = vld [vmem:[%s981_s1 + $0x28] sm:$0xff]  }
   0x7   :  { %311 = vmatpush1.bf16.msra.mxu1 %v710_v5  ;;  %v724_v19 = vld [vmem:[%s981_s1 + $0x70] sm:$0xff]   ;;  %v582_v23 = vld.sshfl [vmem:[%s980_s0] sm:$0x33 pattern:$0x75316420]  ;;  %v727_v24 = vld [vmem:[%s981_s1 + $0x78] sm:$0xff]  }
   0x8   :  { %630 = vmatpush3.bf16.msra.mxu0 %v711_v6  ;;  %312 = vmatprep.subr.bf16.mxu1 %v769_v1  ;;  %v725_v21 = vld [vmem:[%s981_s1 + $0xb0] sm:$0xff]   ;;  %v728_v28 = vld [vmem:[%s981_s1 + $0xb8] sm:$0xff]   ;;  %v94_v29 = vcombine.high %v582_v23, %v582_v23  ;;  %v730_v33 = vld [vmem:[%s981_s1 + $0xc0] sm:$0xff]   ;;  %v101_v36 = vrot.slane %v582_v23, %v100_v32 }
   0x9   :  { %631 = vmatprep.subr.bf16.mxu0 %v712_v7  ;;  %v726_v22 = vld [vmem:[%s981_s1 + $0x30] sm:$0xff]   ;;  %v729_v31 = vld [vmem:[%s981_s1 + $0x38] sm:$0xff]   ;;  %v731_v34 = vld [vmem:[%s983_s3] sm:$0xff]  }
   0xa   :  { %v108_v35 = vrot.slane %v94_v29, %v100_v32  ;;  %v109_v39 = vcombine.high %v101_v36, %v101_v36  ;;  %v732_v40 = vld [vmem:[%s983_s3 + $0x8] sm:$0xff]  }
   0xb   :  { %313 = vmatpush1.bf16.msra.mxu1 %v713_v8 }
   0xc   :  { %632 = vmatpush3.bf16.msra.mxu0 %v714_v9  ;;  %314 = vmatprep.subr.bf16.mxu1 %v769_v1  ;;  %v110_v37 = vcombine.high %v108_v35, %v108_v35 }
   0xd   :  { %633 = vmatprep.subr.bf16.mxu0 %v715_v10  ;;  %300 = vmatprep.mubr.bf16.mxu0 %v108_v35 }
   0xe   :  { %608 = vmatprep.mubr.msk.bf16.mxu1 %vm264_vm0, %v110_v37 }
   0xf   :  { %315 = vmatpush1.bf16.msra.mxu1 %v716_v11 }
  0x10   :  { %634 = vmatpush3.bf16.msra.mxu0 %v717_v12  ;;  %316 = vmatprep.subr.bf16.mxu1 %v769_v1 }
  0x11   :  { %635 = vmatprep.subr.bf16.mxu0 %v718_v13 }
  0x13   :  { %317 = vmatpush1.bf16.msra.mxu1 %v719_v14 }
  0x14   :  { %636 = vmatpush3.bf16.msra.mxu0 %v720_v15  ;;  %318 = vmatprep.subr.bf16.mxu1 %v769_v1 }
  0x15   :  { %637 = vmatprep.subr.bf16.mxu0 %v721_v16 }
  0x17   :  { %319 = vmatpush1.bf16.msra.mxu1 %v722_v17 }
  0x18   :  { %638 = vmatpush3.bf16.msra.mxu0 %v723_v18  ;;  %320 = vmatprep.subr.bf16.mxu1 %v769_v1 }
  0x19   :  { %639 = vmatprep.subr.bf16.mxu0 %v724_v19 }
  0x1b   :  { %321 = vmatpush1.bf16.msra.mxu1 %v725_v21 }
  0x1c   :  { %640 = vmatpush3.bf16.msra.mxu0 %v726_v22  ;;  %322 = vmatprep.subr.bf16.mxu1 %v769_v1 }
  0x1d   :  { %641 = vmatprep.subr.bf16.mxu0 %v727_v24 }
  0x1f   :  { %323 = vmatpush1.bf16.msra.mxu1 %v728_v28 }
  0x20   :  { %642 = vmatpush3.bf16.msra.mxu0 %v729_v31  ;;  %324 = vmatprep.subr.bf16.mxu1 %v769_v1 }
  0x21   :  { %665 = vmatprep.subr.bf16.mxu0 %v771_v38 }
  0x23   :  { %301 = vmatmul.mubr.bf16.vlgmr.msra.gmra.mrb[0].mxu0 %v101_v36  ;;  %325 = vmatpush1.bf16.msra.mxu1 %v730_v33 }
  0x24   :  { %666 = vmatpush3.bf16.msra.mxu0 %v731_v34 }
  0x25   :  { %12 = vsyncpa [#allocation3], 0  ;;  %667 = vmatprep.subr.bf16.mxu0 %v771_v38  ;;  %685 = vmatprep.subr.bf16.mxu1 %v771_v38  ;;  %v733_v41 = vld [vmem:[%s983_s3 + $0x10] sm:$0xff]   ;;  %v734_v42 = vld [vmem:[%s983_s3 + $0x18] sm:$0xff]   ;;  %vm421_vm1 = vcmask 1043456   ;;  %vm772_vm2 = vmmov 0  }
  0x26   :  { %341 = vmatmul.mubr.bf16.vlgmr.msra.gmra.mrb[0].mxu1 %v109_v39  ;;  %v735_v43 = vld [vmem:[%s983_s3 + $0x20] sm:$0xff]   ;;  %v736_v44 = vld [vmem:[%s983_s3 + $0x28] sm:$0xff]   ;;  %v737_v45 = vld [vmem:[%s983_s3 + $0x30] sm:$0xff]   ;;  %681 = vmatprep.mubr.msk.bf16.mxu0 %vm772_vm2, %v771_v38  ;;  %vm417_vm3 = vcmask 982016   ;;  %vm522_vm4 = vcmask 1041408   ;;  %vm518_vm5 = vcmask 687104  }
  0x27   :  { %v738_v46 = vld [vmem:[%s983_s3 + $0x38] ss:$0 sps:$4 sm:$0xff]   ;;  %697 = vmatprep.mubr.msk.bf16.mxu1 %vm772_vm2, %v771_v38  ;;  %v739_v48 = vld [vmem:[%s985_s5] sm:$0xff]   ;;  %v740_v49 = vld [vmem:[%s985_s5 + $0x8] sm:$0xff]  }
  0x28   :  { %668 = vmatpush3.bf16.msra.mxu0 %v732_v40  ;;  %v423_v47 = vsel %vm421_vm1, %v738_v46, 0  ;;  %686 = vmatpush3.bf16.msra.mxu1 %v739_v48  ;;  %v741_v50 = vld [vmem:[%s985_s5 + $0x10] sm:$0xff]   ;;  %v742_v51 = vld [vmem:[%s985_s5 + $0x18] sm:$0xff]   ;;  %v581_v54 = vld [vmem:[%s982_s2] ss:$0 sm:$0xff] }
  0x29   :  { %669 = vmatprep.subr.bf16.mxu0 %v771_v38  ;;  %687 = vmatprep.subr.bf16.mxu1 %v771_v38  ;;  %v743_v2 = vld [vmem:[%s985_s5 + $0x20] sm:$0xff]   ;;  %v744_v3 = vld [vmem:[%s985_s5 + $0x28] ss:$0 sps:$4 sm:$0x33]   ;;  %s773_s5 = smov [#allocation2]  }
  0x2a   :  { %v524_v4 = vsel %vm522_vm4, %v744_v3, 0  ;;  %v609_v5 = vld [vmem:[%s984_s4] ss:$0 sm:$0xff]  ;;  %s573_s12 = sshll.u32 %s773_s5, 4  ;;  %s574_s12 = int_to_ptr.vmem [resolvable:$true] %s573_s12 }
  0x2b   :  { %v619_v13 = vld [vmem:[%s986_s6] ss:$0 sm:$0xff]  ;;  %s745_s4 = scalar_lea.vmem %s574_s12, 32  ;;  %p750_p1 = scmp.lt.s32.totalorder %s574_s12, %s574_s12 }
  0x2c   :  { %670 = vmatpush3.bf16.msra.mxu0 %v733_v41  ;;  %688 = vmatpush3.bf16.msra.mxu1 %v740_v49  ;;  %p746_p0 = scmp.ne.s32.totalorder %s574_s12, %s745_s4  ;;  %p751_p2 = scmp.lt.s32.totalorder %s745_s4, %s745_s4 }
  0x2d   :  { %671 = vmatprep.subr.bf16.mxu0 %v771_v38  ;;  %689 = vmatprep.subr.bf16.mxu1 %v771_v38 }
  0x2e   :  { %p752_p3 = por %p751_p2, %p750_p1 }
  0x30   :  { %672 = vmatpush3.bf16.msra.mxu0 %v734_v42  ;;  %690 = vmatpush3.bf16.msra.mxu1 %v741_v50  ;;  %p753_p4 = pnand %p752_p3, %p746_p0 }
  0x31   :  { %673 = vmatprep.subr.bf16.mxu0 %v771_v38  ;;  %691 = vmatprep.subr.bf16.mxu1 %v771_v38 }
  0x34   :  { %674 = vmatpush3.bf16.msra.mxu0 %v735_v43  ;;  %692 = vmatpush3.bf16.msra.mxu1 %v742_v51 }
  0x35   :  { %675 = vmatprep.subr.bf16.mxu0 %v771_v38  ;;  %693 = vmatprep.subr.bf16.mxu1 %v771_v38 }
  0x38   :  { %676 = vmatpush3.bf16.msra.mxu0 %v736_v44  ;;  %694 = vmatpush3.bf16.msra.mxu1 %v743_v2 }
  0x39   :  { %677 = vmatprep.subr.bf16.mxu0 %v771_v38  ;;  %695 = vmatprep.subr.bf16.mxu1 %v771_v38 }
  0x3c   :  { %678 = vmatpush3.bf16.msra.mxu0 %v737_v45  ;;  %696 = vmatpush3.bf16.msra.mxu1 %v524_v4 }
  0x3d   :  { %679 = vmatprep.subr.bf16.mxu0 %v771_v38 }
  0x40   :  { %680 = vmatpush3.bf16.msra.mxu0 %v423_v47 }
  0xf6   :  { %v643_v52 = vpop.f32.mrb[0].mxu0 }
  0xf7   :  { %v644_v53 = vpop.f32.mrb[1].mxu0 }
  0xf8   :  { %v645_v55 = vadd.f32 %v644_v53, %v643_v52  ;;  %v646_v56 = vpop.f32.mrb[2].mxu0 }
  0xf9   :  { %v647_v57 = vpop.f32.mrb[3].mxu0  ;;  %v342_v58 = vpop.f32.mrb[0].mxu1 }
  0xfa   :  { %v303_v59 = vadd.f32 %v645_v55, %v581_v54  ;;  %v344_v60 = vpop.f32.mrb[1].mxu1 }
  0xfb   :  { %v345_v61 = vpop.f32.mrb[2].mxu1 }
  0xfc   :  { %v343_v62 = vadd.f32 %v342_v58, %v303_v59  ;;  %v346_v63 = vpop.f32.mrb[3].mxu1 }
  0xfe   :  { %v348_v0 = vmax.f32 %v343_v62, 0.0 }
 0x100   :  { %v349_v1 = vpack.c.bf16 %v348_v0, %v348_v0 }
 0x102   :  { %682 = vmatmul.mubr.msk.bf16.vlgmr.msra.gmra.mrb[4].mxu0 %vm417_vm3, %v349_v1 }
 0x1d5   :  { %v459_v6 = vpop.f32.mrb[4].mxu0 }
 0x1d6   :  { %v460_v7 = vadd.f32 %v609_v5, %v459_v6  ;;  %v683_v8 = vpop.f32.mrb[5].mxu0 }
 0x1d7   :  { %v462_v9 = vpop.f32.mrb[6].mxu0 }
 0x1d8   :  { %v465_v10 = vmax.f32 %v460_v7, 0.0  ;;  %v684_v11 = vpop.f32.mrb[7].mxu0 }
 0x1da   :  { %v466_v12 = vpack.c.bf16 %v465_v10, %v465_v10 }
 0x1dc   :  { %698 = vmatmul.mubr.msk.bf16.vlgmr.msra.gmra.mrb[4].mxu1 %vm518_vm5, %v466_v12 }
 0x2af   :  { %v560_v14 = vpop.f32.mrb[4].mxu1 }
 0x2b0   :  { %v561_v15 = vadd.f32 %v619_v13, %v560_v14  ;;  %v699_v16 = vpop.f32.mrb[5].mxu1 }
 0x2b1   :  { %v563_v17 = vpop.f32.mrb[6].mxu1 }
 0x2b2   :  { %566 = vst [vmem:[#allocation2] sm:$0x3] %v561_v15  ;;  %v700_v18 = vpop.f32.mrb[7].mxu1 }
 0x2b3   :  { %756 = shalt.err (!%p753_p4)
}
 0x2b4   :  { %s757_s6 = scalar_lea.hbm %s987_s7, 32 }
 0x2b5   :  { %p758_p5 = scmp.ne.s32.totalorder %s987_s7, %s757_s6  ;;  %p761_p6 = scmp.lt.u32.totalorder %s757_s6, %s987_s7 }
 0x2b7   :  { %p763_p7 = pnand %p761_p6, %p758_p5 }
 0x2b9   :  { %766 = shalt.err (!%p763_p7)
}
 0x2ba   :  { %576 = dma.vmem_to_hbm [thread:$0]  %s574_s12, 32, %s987_s7, [#allocation3]  }
 0x2bb   :  { %767 = dma.done.wait [#allocation3], 32  }
 0x2bc   :  { %768 = vsyncadd [#allocation3], 4294967264 }
 0x2bd   :  { %580 = vsyncpa [#allocation3], 1 }

</bundles_post_ra>
